<compile_context>
chip_gen: v7x
topology: tpu7x:2x2x1
jax: 0.10.0
libtpu: 0.0.40
codegen_flags: <defaults>
</compile_context>

<pallas_src>
import functools

import jax
import jax.numpy as jnp
from jax.experimental import pallas as pl
from jax.experimental.pallas import tpu as pltpu


# ----------------------------------------------------------------------------
# In-kernel exact GELU (PyTorch F.gelu default = 0.5*x*(1+erf(x/sqrt(2)))).
# erf via Abramowitz & Stegun 7.1.26 polynomial (abs err ~1.5e-7).
# ----------------------------------------------------------------------------
def _recip(d):
    # EUP approximate reciprocal + one Newton-Raphson step (~f32 accurate);
    # keeps the divide off the VPU VALU slots (per perf review).
    r = pl.reciprocal(d, approx=True)
    return r * (2.0 - d * r)


def _erf(z):
    p = jnp.float32(0.3275911)
    a1 = jnp.float32(0.254829592)
    a2 = jnp.float32(-0.284496736)
    a3 = jnp.float32(1.421413741)
    a4 = jnp.float32(-1.453152027)
    a5 = jnp.float32(1.061405429)
    az = jnp.abs(z)
    t = _recip(1.0 + p * az)
    poly = ((((a5 * t + a4) * t + a3) * t + a2) * t + a1) * t
    r = 1.0 - poly * jnp.exp(-az * az)
    return jnp.where(z >= 0.0, r, -r)


def _gelu_exact(x):
    return 0.5 * x * (1.0 + _erf(x * jnp.float32(0.70710678118654752440)))


# ----------------------------------------------------------------------------
# Kernel 1: spectral channel mixing via block-complex packing.
#   x_pack[k, b, :]  = [xr | xi]                (K, B, 2C)
#   w_block[k]       = [[wr, wi], [-wi, wr]]    (K, 2C, 2C)
#   out[k]           = x_pack[k] @ w_block[k]   -> columns [real | imag]
# One real MXU matmul per mode, contraction dim = 2C.
# ----------------------------------------------------------------------------
def _spectral_kernel(x_ref, w_ref, o_ref):
    w = w_ref[...]                                   # (kt, 2C, 2C)
    x = x_ref[...].astype(w.dtype)                   # (kt, B, 2C)
    o_ref[...] = jax.lax.dot_general(
        x, w,
        dimension_numbers=(((2,), (1,)), ((0,), (0,))),
        preferred_element_type=jnp.float32)


def _choose_k_tile(K, B, C2, budget_bytes=20 * 1024 * 1024):
    # f32 bytes per mode row: input (B*C2) + output (B*C2) + weight (C2*C2),
    # times 2 for double buffering must fit the budget.
    per_k = 4 * (2 * B * C2 + C2 * C2)
    kt = max(1, budget_bytes // (2 * per_k))
    # Keep >= 2 (prefer 4) parallel grid steps so both v7x TensorCores stay busy.
    target_steps = 4 if K >= 4 else max(1, K)
    kt = min(kt, K, -(-K // target_steps))
    if kt >= 8:
        kt = (kt // 8) * 8
    return int(max(1, kt))


def spectral_channel_mix(x_pack, w_block, kt):
    K, B, C2 = x_pack.shape
    Kp = w_block.shape[0]                            # weights pre-padded in prepare_params
    if Kp % kt != 0:                                 # safety fallback only
        kt = Kp
    if Kp != K:                                      # pad activations only (cheap)
        x_pack = jnp.pad(x_pack, ((0, Kp - K), (0, 0), (0, 0)))

    per_step = 4 * kt * (2 * B * C2 + C2 * C2)
    vmem_limit = int(min(48 * 1024 * 1024,
                         max(32 * 1024 * 1024, 4 * per_step)))

    x_spec = pl.BlockSpec((kt, B, C2), lambda k: (k, 0, 0))
    w_spec = pl.BlockSpec((kt, C2, C2), lambda k: (k, 0, 0))

    out = pl.pallas_call(
        _spectral_kernel,
        grid=(Kp // kt,),
        in_specs=[x_spec, w_spec],
        out_specs=x_spec,
        out_shape=jax.ShapeDtypeStruct((Kp, B, C2), jnp.float32),
        compiler_params=pltpu.CompilerParams(
            dimension_semantics=("parallel",),
            vmem_limit_bytes=vmem_limit),
    )(x_pack, w_block)
    return out[:K]


# ----------------------------------------------------------------------------
# Kernel 2: fused 1x1-conv MLP + skip 1x1 conv + residual (+ optional gelu),
# operating directly on the NCHW tensor viewed as (B, C, H*W).
# Second stage is ONE matmul: [w2^T | w_skip^T] (C,2C) @ [h ; x] (2C, T).
# ----------------------------------------------------------------------------
def _pointwise_kernel(x1_ref, x_ref, w1t_ref, b1_ref, w2w_ref, bf_ref, o_ref,
                      *, activation, fuse_second):
    cdt = w1t_ref.dtype
    x1 = x1_ref[0]                                   # (C, T) spectral-conv output
    x = x_ref[0]                                     # (C, T) skip-path input

    h = jnp.dot(w1t_ref[...], x1.astype(cdt),
                preferred_element_type=jnp.float32) + b1_ref[...]
    h = _gelu_exact(h)

    w2w = w2w_ref[...]                               # (C, 2C) = [w2^T | w_skip^T]
    if fuse_second:
        # stack [h ; x] -> (2C, T): single MXU pass with a 2C contraction.
        z = jnp.concatenate([h, x], axis=0)
        y = jnp.dot(w2w, z.astype(cdt), preferred_element_type=jnp.float32)
    else:                                            # fallback for C not mult. of 8
        C = h.shape[0]
        y = (jnp.dot(w2w[:, :C], h.astype(cdt), preferred_element_type=jnp.float32)
             + jnp.dot(w2w[:, C:], x.astype(cdt), preferred_element_type=jnp.float32))
    y = y + bf_ref[...]
    if activation == "gelu":
        y = _gelu_exact(y)
    o_ref[0, :, :] = y


def _pick_hw_tile(hw, c, budget_bytes=20 * 1024 * 1024):
    # 3 f32 streams (x1, x, out), 2-deep double buffering -> ~24*c*tile bytes live.
    max_tile = max(128, budget_bytes // (24 * c))
    for t in (8192, 4096, 2048, 1024, 512, 256, 128):
        if t <= max_tile and hw % t == 0:
            return t, hw
    if hw <= 512:                                    # tiny grid: one lane-padded block
        hwp = pl.cdiv(hw, 128) * 128
        return hwp, hwp
    t = max(128, min(512, (max_tile // 128) * 128))  # irregular HW: pad up, keep big tiles
    return t, pl.cdiv(hw, t) * t


def fused_pointwise(x1, x, kp, activation):
    # x1, x: (B, C, HW) float32
    B, C, HW = x.shape
    tile, HWp = _pick_hw_tile(HW, C)
    if HWp != HW:
        pad = ((0, 0), (0, 0), (0, HWp - HW))
        x1 = jnp.pad(x1, pad)
        x = jnp.pad(x, pad)

    row_spec = pl.BlockSpec((1, C, tile), lambda b, j: (b, 0, j))
    w1_spec = pl.BlockSpec((C, C), lambda b, j: (0, 0))
    w2_spec = pl.BlockSpec((C, 2 * C), lambda b, j: (0, 0))
    vec_spec = pl.BlockSpec((C, 1), lambda b, j: (0, 0))

    need = 2 * 3 * 4 * C * tile + 4 * (3 * C * C + 2 * C)
    vmem_limit = int(min(48 * 1024 * 1024, max(32 * 1024 * 1024, 2 * need)))

    out = pl.pallas_call(
        functools.partial(_pointwise_kernel, activation=activation,
                          fuse_second=(C % 8 == 0)),
        grid=(B, HWp // tile),
        in_specs=[row_spec, row_spec, w1_spec, vec_spec, w2_spec, vec_spec],
        out_specs=row_spec,
        out_shape=jax.ShapeDtypeStruct((B, C, HWp), jnp.float32),
        compiler_params=pltpu.CompilerParams(
            dimension_semantics=("parallel", "parallel"),
            vmem_limit_bytes=vmem_limit),
    )(x1, x, kp["w1t"], kp["b1"], kp["w2w"], kp["bf"])
    return out[:, :, :HW]


# ----------------------------------------------------------------------------
# One-time parameter preparation (hoisted out of the hot forward path).
# ----------------------------------------------------------------------------
def prepare_params(params, modes1, modes2, batch_size, use_bf16=False):
    C = params["mlp_w1"].shape[0]
    K = 2 * modes1 * modes2
    w_dtype = jnp.bfloat16 if use_bf16 else jnp.float32

    # Spectral weights: (Ci, Co, m1, m2) x2 -> mode-major block-complex (K, 2C, 2C).
    wc = jnp.concatenate([params["spec_w1"], params["spec_w2"]], axis=2)
    w_km = jnp.transpose(wc, (2, 3, 0, 1)).reshape(K, C, C)
    wr = jnp.real(w_km).astype(jnp.float32)
    wi = jnp.imag(w_km).astype(jnp.float32)
    # [xr | xi] @ [[wr, wi], [-wi, wr]] = [xr*wr - xi*wi | xr*wi + xi*wr]
    w_block = jnp.concatenate(
        [jnp.concatenate([wr, wi], axis=2),
         jnp.concatenate([-wi, wr], axis=2)], axis=1).astype(w_dtype)

    kt = _choose_k_tile(K, batch_size, 2 * C)
    Kp = pl.cdiv(K, kt) * kt
    if Kp != K:                                      # one-time pad (not per call)
        w_block = jnp.pad(w_block, ((0, Kp - K), (0, 0), (0, 0)))

    return dict(
        spec_w=w_block,
        spec_kt=kt,                                  # static int, pop before jit
        # 1x1 convs stored as W^T so the kernel computes W^T @ x (NCHW layout).
        w1t=jnp.asarray(params["mlp_w1"]).T.astype(w_dtype),
        b1=jnp.asarray(params["mlp_b1"]).reshape(C, 1).astype(jnp.float32),
        # fused second stage: [w2^T | w_skip^T]; mlp2 & skip biases pre-summed.
        w2w=jnp.concatenate([jnp.asarray(params["mlp_w2"]).T,
                             jnp.asarray(params["w_w"]).T], axis=1).astype(w_dtype),
        bf=(params["mlp_b2"] + params["w_b"]).reshape(C, 1).astype(jnp.float32),
    )


# ----------------------------------------------------------------------------
# Full NeuralOperator forward (takes kernel-ready params from prepare_params).
# ----------------------------------------------------------------------------
def neural_operator_forward(x, kp, modes1, modes2, activation="none", spec_kt=None):
    # x is NCHW (B, C, H, W) float32, same as the PyTorch module.
    B, C, H, W = x.shape
    x = x.astype(jnp.float32)
    m1, m2 = modes1, modes2
    K = 2 * m1 * m2

    # ---- SpectralConv2d ----
    # TODO(synk): rfft2 / irfft2 have no Pallas primitive; they stay in plain JAX.
    x_ft = jnp.fft.rfft2(x, axes=(-2, -1))                     # (B,C,H,W//2+1) c64
    top = x_ft[:, :, :m1, :m2]
    bot = x_ft[:, :, H - m1:, :m2]
    xc = jnp.concatenate([top, bot], axis=2)                   # (B,C,2m1,m2)
    # Single complex transpose to mode-major, then channel-packed [xr | xi].
    xkm = jnp.transpose(xc, (2, 3, 0, 1)).reshape(K, B, C)
    x_pack = jnp.concatenate([jnp.real(xkm), jnp.imag(xkm)], axis=-1)  # (K,B,2C)

    kt = spec_kt if spec_kt is not None else kp["spec_w"].shape[0]
    out = spectral_channel_mix(x_pack, kp["spec_w"], kt)       # (K,B,2C) [re|im]
    out = jnp.transpose(out.reshape(2 * m1, m2, B, 2 * C), (2, 3, 0, 1))  # (B,2C,2m1,m2)
    out_c = jax.lax.complex(out[:, :C], out[:, C:])            # (B,C,2m1,m2)

    Wh = W // 2 + 1
    out_ft = jnp.zeros((B, C, H, Wh), dtype=jnp.complex64)
    out_ft = out_ft.at[:, :, :m1, :m2].set(out_c[:, :, :m1, :])
    out_ft = out_ft.at[:, :, H - m1:, :m2].set(out_c[:, :, m1:, :])
    x1 = jnp.fft.irfft2(out_ft, s=(H, W), axes=(-2, -1)).astype(jnp.float32)

    # ---- ConvMLP(x1) + w(x) + residual (+ activation), fused, NCHW-native ----
    y = fused_pointwise(x1.reshape(B, C, H * W),
                        x.reshape(B, C, H * W),
                        kp, activation)
    return y.reshape(B, C, H, W)


# ----------------------------------------------------------------------------
# Pure-JAX reference (mirrors the PyTorch forward) for validation.
# ----------------------------------------------------------------------------
def reference_forward(x, params, modes1, modes2, activation="none"):
    B, C, H, W = x.shape
    x = x.astype(jnp.float32)
    x_ft = jnp.fft.rfft2(x, axes=(-2, -1))
    out_ft = jnp.zeros((B, C, H, W // 2 + 1), dtype=jnp.complex64)
    out_ft = out_ft.at[:, :, :modes1, :modes2].set(
        jnp.einsum("bixy,ioxy->boxy", x_ft[:, :, :modes1, :modes2], params["spec_w1"]))
    out_ft = out_ft.at[:, :, H - modes1:, :modes2].set(
        jnp.einsum("bixy,ioxy->boxy", x_ft[:, :, H - modes1:, :modes2], params["spec_w2"]))
    x1 = jnp.fft.irfft2(out_ft, s=(H, W), axes=(-2, -1)).astype(jnp.float32)

    def conv1x1(z, wmat, b):
        return jnp.einsum("bihw,io->bohw", z, wmat) + b[None, :, None, None]

    def gelu(z):
        return 0.5 * z * (1.0 + jax.scipy.special.erf(z / jnp.sqrt(2.0)))

    h = gelu(conv1x1(x1, params["mlp_w1"], params["mlp_b1"]))
    y1 = conv1x1(h, params["mlp_w2"], params["mlp_b2"])
    y2 = conv1x1(x, params["w_w"], params["w_b"])
    y = y1 + y2
    if activation == "gelu":
        y = gelu(y)
    return y


# ----------------------------------------------------------------------------
# Deterministic parameter construction (shapes from the PyTorch __init__).
# ----------------------------------------------------------------------------
def init_params(key, width, modes1, modes2):
    ks = jax.random.split(key, 10)
    scale = 1.0 / (width * width)
    spec_w1 = scale * (jax.random.uniform(ks[0], (width, width, modes1, modes2))
                       + 1j * jax.random.uniform(ks[1], (width, width, modes1, modes2)))
    spec_w2 = scale * (jax.random.uniform(ks[2], (width, width, modes1, modes2))
                       + 1j * jax.random.uniform(ks[3], (width, width, modes1, modes2)))
    bound = 1.0 / jnp.sqrt(width)
    u = lambda k, shape: jax.random.uniform(k, shape, jnp.float32, -bound, bound)
    return dict(
        spec_w1=spec_w1.astype(jnp.complex64),
        spec_w2=spec_w2.astype(jnp.complex64),
        mlp_w1=u(ks[4], (width, width)), mlp_b1=u(ks[5], (width,)),
        mlp_w2=u(ks[6], (width, width)), mlp_b2=u(ks[7], (width,)),
        w_w=u(ks[8], (width, width)),    w_b=u(ks[9], (width,)),
    )


if __name__ == "__main__":
    B, width, H, W = 2, 8, 16, 16
    modes1, modes2 = 4, 4
    activation = "gelu"

    key = jax.random.PRNGKey(0)
    kx, kparam = jax.random.split(key)
    x = jax.random.normal(kx, (B, width, H, W), dtype=jnp.float32)
    params = init_params(kparam, width, modes1, modes2)

    kernel_params = prepare_params(params, modes1, modes2, batch_size=B)  # one-time
    spec_kt = kernel_params.pop("spec_kt")                                # static int

    fwd = jax.jit(functools.partial(neural_operator_forward,
                                    modes1=modes1, modes2=modes2,
                                    activation=activation, spec_kt=spec_kt))
    y = fwd(x, kernel_params)
    jax.block_until_ready(y)

    y_ref = reference_forward(x, params, modes1, modes2, activation)
    err = float(jnp.max(jnp.abs(y - y_ref)))
    assert y.shape == (B, width, H, W)
    assert err < 1e-4, f"max abs err {err}"

    print("KERNEL_OK")
</pallas_src>

<mosaic_0001>
module attributes {stable_mosaic.version = 11 : i64} {
  func.func @_spectral_kernel(%arg0: i32, %arg1: memref<8x2x16xf32, #tpu.memory_space<vmem>>, %arg2: memref<8x16x16xf32, #tpu.memory_space<vmem>>, %arg3: memref<8x2x16xf32, #tpu.memory_space<vmem>>) attributes {dimension_semantics = [#tpu.dimension_semantics<parallel>], iteration_bounds = array<i64: 4>, scalar_prefetch = 0 : i64, scratch_operands = 0 : i64, tpu.core_type = #tpu.core_type<tc>, window_params = [{transform_indices = @transform_0, window_bounds = array<i64: 8, 2, 16>}, {transform_indices = @transform_1, window_bounds = array<i64: 8, 16, 16>}, {transform_indices = @transform_2, window_bounds = array<i64: 8, 2, 16>}]} {
    %c0 = arith.constant 0 : index
    %c0_0 = arith.constant 0 : index
    %c0_1 = arith.constant 0 : index
    %0 = vector.load %arg2[%c0, %c0_0, %c0_1] : memref<8x16x16xf32, #tpu.memory_space<vmem>>, vector<8x16x16xf32>
    %c0_2 = arith.constant 0 : index
    %c0_3 = arith.constant 0 : index
    %c0_4 = arith.constant 0 : index
    %1 = vector.load %arg1[%c0_2, %c0_3, %c0_4] : memref<8x2x16xf32, #tpu.memory_space<vmem>>, vector<8x2x16xf32>
    %cst = arith.constant dense<0.000000e+00> : vector<8x2x16xf32>
    %2 = tpu.matmul %1, %0, %cst {dimension_numbers = #tpu.dot_dimension_numbers<[2], [1], [1], [2], [0, 0, 0, 1, 1, 2], [0], [0]>} : vector<8x2x16xf32>, vector<8x16x16xf32>, vector<8x2x16xf32> -> vector<8x2x16xf32>
    %c0_5 = arith.constant 0 : index
    %c0_6 = arith.constant 0 : index
    %c0_7 = arith.constant 0 : index
    %3 = vector.load %arg3[%c0_5, %c0_6, %c0_7] : memref<8x2x16xf32, #tpu.memory_space<vmem>>, vector<8x2x16xf32>
    tpu.vector_store %arg3[%c0_5, %c0_6, %c0_7], %2 {strides = array<i32>} : memref<8x2x16xf32, #tpu.memory_space<vmem>>, vector<8x2x16xf32>,
    return
  }
  func.func @transform_0(%arg0: i32) -> (i32, i32, i32) {
    %c0_i32 = arith.constant 0 : i32
    %c0_i32_0 = arith.constant 0 : i32
    %c0_i32_1 = arith.constant 0 : i32
    return %arg0, %c0_i32, %c0_i32_0 : i32, i32, i32
  }
  func.func @transform_1(%arg0: i32) -> (i32, i32, i32) {
    %c0_i32 = arith.constant 0 : i32
    %c0_i32_0 = arith.constant 0 : i32
    %c0_i32_1 = arith.constant 0 : i32
    return %arg0, %c0_i32, %c0_i32_0 : i32, i32, i32
  }
  func.func @transform_2(%arg0: i32) -> (i32, i32, i32) {
    %c0_i32 = arith.constant 0 : i32
    %c0_i32_0 = arith.constant 0 : i32
    %c0_i32_1 = arith.constant 0 : i32
    return %arg0, %c0_i32, %c0_i32_0 : i32, i32, i32
  }
}

module attributes {stable_mosaic.version = 11 : i64} {
  func.func @_pointwise_kernel(%arg0: i32, %arg1: i32, %arg2: memref<1x8x256xf32, #tpu.memory_space<vmem>>, %arg3: memref<1x8x256xf32, #tpu.memory_space<vmem>>, %arg4: memref<8x8xf32, #tpu.memory_space<vmem>>, %arg5: memref<8x1xf32, #tpu.memory_space<vmem>>, %arg6: memref<8x16xf32, #tpu.memory_space<vmem>>, %arg7: memref<8x1xf32, #tpu.memory_space<vmem>>, %arg8: memref<1x8x256xf32, #tpu.memory_space<vmem>>) attributes {dimension_semantics = [#tpu.dimension_semantics<parallel>, #tpu.dimension_semantics<parallel>], iteration_bounds = array<i64: 2, 1>, scalar_prefetch = 0 : i64, scratch_operands = 0 : i64, tpu.core_type = #tpu.core_type<tc>, window_params = [{transform_indices = @transform_0, window_bounds = array<i64: 1, 8, 256>}, {transform_indices = @transform_1, window_bounds = array<i64: 1, 8, 256>}, {pipeline_mode = #tpu.pipeline_mode<synchronous>, transform_indices = @transform_2, window_bounds = array<i64: 8, 8>}, {pipeline_mode = #tpu.pipeline_mode<synchronous>, transform_indices = @transform_3, window_bounds = array<i64: 8, 1>}, {pipeline_mode = #tpu.pipeline_mode<synchronous>, transform_indices = @transform_4, window_bounds = array<i64: 8, 16>}, {pipeline_mode = #tpu.pipeline_mode<synchronous>, transform_indices = @transform_5, window_bounds = array<i64: 8, 1>}, {transform_indices = @transform_6, window_bounds = array<i64: 1, 8, 256>}]} {
    %c0 = arith.constant 0 : index
    %c0_0 = arith.constant 0 : index
    %c0_1 = arith.constant 0 : index
    %0 = vector.load %arg2[%c0, %c0_0, %c0_1] : memref<1x8x256xf32, #tpu.memory_space<vmem>>, vector<1x8x256xf32>
    %1 = vector.shape_cast %0 : vector<1x8x256xf32> to vector<8x256xf32>
    %c0_2 = arith.constant 0 : index
    %c0_3 = arith.constant 0 : index
    %c0_4 = arith.constant 0 : index
    %2 = vector.load %arg3[%c0_2, %c0_3, %c0_4] : memref<1x8x256xf32, #tpu.memory_space<vmem>>, vector<1x8x256xf32>
    %3 = vector.shape_cast %2 : vector<1x8x256xf32> to vector<8x256xf32>
    %c0_5 = arith.constant 0 : index
    %c0_6 = arith.constant 0 : index
    %4 = vector.load %arg4[%c0_5, %c0_6] : memref<8x8xf32, #tpu.memory_space<vmem>>, vector<8x8xf32>
    %cst = arith.constant dense<0.000000e+00> : vector<8x256xf32>
    %5 = tpu.matmul %4, %1, %cst {dimension_numbers = #tpu.dot_dimension_numbers<[1], [0], [0], [1], [0, 0, 1, 1], [], []>} : vector<8x8xf32>, vector<8x256xf32>, vector<8x256xf32> -> vector<8x256xf32>
    %c0_7 = arith.constant 0 : index
    %c0_8 = arith.constant 0 : index
    %6 = vector.load %arg5[%c0_7, %c0_8] : memref<8x1xf32, #tpu.memory_space<vmem>>, vector<8x1xf32>
    %7 = vector.broadcast %6 : vector<8x1xf32> to vector<8x256xf32>
    %8 = arith.addf %5, %7 : vector<8x256xf32>
    %cst_9 = arith.constant 5.000000e-01 : f32
    %9 = vector.broadcast %cst_9 : f32 to vector<8x256xf32>
    %10 = arith.mulf %9, %8 : vector<8x256xf32>
    %cst_10 = arith.constant 0.707106769 : f32
    %11 = vector.broadcast %cst_10 : f32 to vector<8x256xf32>
    %12 = arith.mulf %8, %11 : vector<8x256xf32>
    %13 = math.absf %12 : vector<8x256xf32>
    %cst_11 = arith.constant 0.327591091 : f32
    %14 = vector.broadcast %cst_11 : f32 to vector<8x256xf32>
    %15 = arith.mulf %14, %13 : vector<8x256xf32>
    %cst_12 = arith.constant 1.000000e+00 : f32
    %16 = vector.broadcast %cst_12 : f32 to vector<8x256xf32>
    %17 = arith.addf %16, %15 : vector<8x256xf32>
    %18 = tpu.reciprocal %17 {approx = true} : vector<8x256xf32> -> vector<8x256xf32>
    %19 = arith.mulf %17, %18 : vector<8x256xf32>
    %cst_13 = arith.constant 2.000000e+00 : f32
    %20 = vector.broadcast %cst_13 : f32 to vector<8x256xf32>
    %21 = arith.subf %20, %19 : vector<8x256xf32>
    %22 = arith.mulf %18, %21 : vector<8x256xf32>
    %cst_14 = arith.constant 1.06140542 : f32
    %23 = vector.broadcast %cst_14 : f32 to vector<8x256xf32>
    %24 = arith.mulf %23, %22 : vector<8x256xf32>
    %cst_15 = arith.constant -1.45315206 : f32
    %25 = vector.broadcast %cst_15 : f32 to vector<8x256xf32>
    %26 = arith.addf %24, %25 : vector<8x256xf32>
    %27 = arith.mulf %26, %22 : vector<8x256xf32>
    %cst_16 = arith.constant 1.42141378 : f32
    %28 = vector.broadcast %cst_16 : f32 to vector<8x256xf32>
    %29 = arith.addf %27, %28 : vector<8x256xf32>
    %30 = arith.mulf %29, %22 : vector<8x256xf32>
    %cst_17 = arith.constant -0.284496725 : f32
    %31 = vector.broadcast %cst_17 : f32 to vector<8x256xf32>
    %32 = arith.addf %30, %31 : vector<8x256xf32>
    %33 = arith.mulf %32, %22 : vector<8x256xf32>
    %cst_18 = arith.constant 0.254829586 : f32
    %34 = vector.broadcast %cst_18 : f32 to vector<8x256xf32>
    %35 = arith.addf %33, %34 : vector<8x256xf32>
    %36 = arith.mulf %35, %22 : vector<8x256xf32>
    %cst_19 = arith.constant 0.000000e+00 : f32
    %37 = vector.broadcast %cst_19 : f32 to vector<8x256xf32>
    %38 = arith.subf %37, %13 : vector<8x256xf32>
    %39 = arith.mulf %38, %13 : vector<8x256xf32>
    %40 = math.exp %39 : vector<8x256xf32>
    %41 = arith.mulf %36, %40 : vector<8x256xf32>
    %cst_20 = arith.constant 1.000000e+00 : f32
    %42 = vector.broadcast %cst_20 : f32 to vector<8x256xf32>
    %43 = arith.subf %42, %41 : vector<8x256xf32>
    %cst_21 = arith.constant 0.000000e+00 : f32
    %44 = vector.broadcast %cst_21 : f32 to vector<8x256xf32>
    %45 = arith.cmpf oge, %12, %44 : vector<8x256xf32>
    %cst_22 = arith.constant 0.000000e+00 : f32
    %46 = vector.broadcast %cst_22 : f32 to vector<8x256xf32>
    %47 = arith.subf %46, %43 : vector<8x256xf32>
    %48 = arith.select %45, %43, %47 : vector<8x256xi1>, vector<8x256xf32>
    %cst_23 = arith.constant 1.000000e+00 : f32
    %49 = vector.broadcast %cst_23 : f32 to vector<8x256xf32>
    %50 = arith.addf %49, %48 : vector<8x256xf32>
    %51 = arith.mulf %10, %50 : vector<8x256xf32>
    %c0_24 = arith.constant 0 : index
    %c0_25 = arith.constant 0 : index
    %52 = vector.load %arg6[%c0_24, %c0_25] : memref<8x16xf32, #tpu.memory_space<vmem>>, vector<8x16xf32>
    %53 = tpu.concatenate %51, %3 in 0 : vector<8x256xf32>, vector<8x256xf32> -> vector<16x256xf32>
    %cst_26 = arith.constant dense<0.000000e+00> : vector<8x256xf32>
    %54 = tpu.matmul %52, %53, %cst_26 {dimension_numbers = #tpu.dot_dimension_numbers<[1], [0], [0], [1], [0, 0, 1, 1], [], []>} : vector<8x16xf32>, vector<16x256xf32>, vector<8x256xf32> -> vector<8x256xf32>
    %c0_27 = arith.constant 0 : index
    %c0_28 = arith.constant 0 : index
    %55 = vector.load %arg7[%c0_27, %c0_28] : memref<8x1xf32, #tpu.memory_space<vmem>>, vector<8x1xf32>
    %56 = vector.broadcast %55 : vector<8x1xf32> to vector<8x256xf32>
    %57 = arith.addf %54, %56 : vector<8x256xf32>
    %cst_29 = arith.constant 5.000000e-01 : f32
    %58 = vector.broadcast %cst_29 : f32 to vector<8x256xf32>
    %59 = arith.mulf %58, %57 : vector<8x256xf32>
    %cst_30 = arith.constant 0.707106769 : f32
    %60 = vector.broadcast %cst_30 : f32 to vector<8x256xf32>
    %61 = arith.mulf %57, %60 : vector<8x256xf32>
    %62 = math.absf %61 : vector<8x256xf32>
    %cst_31 = arith.constant 0.327591091 : f32
    %63 = vector.broadcast %cst_31 : f32 to vector<8x256xf32>
    %64 = arith.mulf %63, %62 : vector<8x256xf32>
    %cst_32 = arith.constant 1.000000e+00 : f32
    %65 = vector.broadcast %cst_32 : f32 to vector<8x256xf32>
    %66 = arith.addf %65, %64 : vector<8x256xf32>
    %67 = tpu.reciprocal %66 {approx = true} : vector<8x256xf32> -> vector<8x256xf32>
    %68 = arith.mulf %66, %67 : vector<8x256xf32>
    %cst_33 = arith.constant 2.000000e+00 : f32
    %69 = vector.broadcast %cst_33 : f32 to vector<8x256xf32>
    %70 = arith.subf %69, %68 : vector<8x256xf32>
    %71 = arith.mulf %67, %70 : vector<8x256xf32>
    %cst_34 = arith.constant 1.06140542 : f32
    %72 = vector.broadcast %cst_34 : f32 to vector<8x256xf32>
    %73 = arith.mulf %72, %71 : vector<8x256xf32>
    %cst_35 = arith.constant -1.45315206 : f32
    %74 = vector.broadcast %cst_35 : f32 to vector<8x256xf32>
    %75 = arith.addf %73, %74 : vector<8x256xf32>
    %76 = arith.mulf %75, %71 : vector<8x256xf32>
    %cst_36 = arith.constant 1.42141378 : f32
    %77 = vector.broadcast %cst_36 : f32 to vector<8x256xf32>
    %78 = arith.addf %76, %77 : vector<8x256xf32>
    %79 = arith.mulf %78, %71 : vector<8x256xf32>
    %cst_37 = arith.constant -0.284496725 : f32
    %80 = vector.broadcast %cst_37 : f32 to vector<8x256xf32>
    %81 = arith.addf %79, %80 : vector<8x256xf32>
    %82 = arith.mulf %81, %71 : vector<8x256xf32>
    %cst_38 = arith.constant 0.254829586 : f32
    %83 = vector.broadcast %cst_38 : f32 to vector<8x256xf32>
    %84 = arith.addf %82, %83 : vector<8x256xf32>
    %85 = arith.mulf %84, %71 : vector<8x256xf32>
    %cst_39 = arith.constant 0.000000e+00 : f32
    %86 = vector.broadcast %cst_39 : f32 to vector<8x256xf32>
    %87 = arith.subf %86, %62 : vector<8x256xf32>
    %88 = arith.mulf %87, %62 : vector<8x256xf32>
    %89 = math.exp %88 : vector<8x256xf32>
    %90 = arith.mulf %85, %89 : vector<8x256xf32>
    %cst_40 = arith.constant 1.000000e+00 : f32
    %91 = vector.broadcast %cst_40 : f32 to vector<8x256xf32>
    %92 = arith.subf %91, %90 : vector<8x256xf32>
    %cst_41 = arith.constant 0.000000e+00 : f32
    %93 = vector.broadcast %cst_41 : f32 to vector<8x256xf32>
    %94 = arith.cmpf oge, %61, %93 : vector<8x256xf32>
    %cst_42 = arith.constant 0.000000e+00 : f32
    %95 = vector.broadcast %cst_42 : f32 to vector<8x256xf32>
    %96 = arith.subf %95, %92 : vector<8x256xf32>
    %97 = arith.select %94, %92, %96 : vector<8x256xi1>, vector<8x256xf32>
    %cst_43 = arith.constant 1.000000e+00 : f32
    %98 = vector.broadcast %cst_43 : f32 to vector<8x256xf32>
    %99 = arith.addf %98, %97 : vector<8x256xf32>
    %100 = arith.mulf %59, %99 : vector<8x256xf32>
    %c0_44 = arith.constant 0 : index
    %c0_45 = arith.constant 0 : index
    %c0_46 = arith.constant 0 : index
    %101 = vector.load %arg8[%c0_44, %c0_45, %c0_46] : memref<1x8x256xf32, #tpu.memory_space<vmem>>, vector<1x8x256xf32>
    %102 = vector.shape_cast %101 : vector<1x8x256xf32> to vector<8x256xf32>
    %103 = vector.shape_cast %100 : vector<8x256xf32> to vector<1x8x256xf32>
    tpu.vector_store %arg8[%c0_44, %c0_45, %c0_46], %103 {strides = array<i32>} : memref<1x8x256xf32, #tpu.memory_space<vmem>>, vector<1x8x256xf32>,
    return
  }
  func.func @transform_0(%arg0: i32, %arg1: i32) -> (i32, i32, i32) {
    %c0_i32 = arith.constant 0 : i32
    %c0_i32_0 = arith.constant 0 : i32
    return %arg0, %c0_i32, %arg1 : i32, i32, i32
  }
  func.func @transform_1(%arg0: i32, %arg1: i32) -> (i32, i32, i32) {
    %c0_i32 = arith.constant 0 : i32
    %c0_i32_0 = arith.constant 0 : i32
    return %arg0, %c0_i32, %arg1 : i32, i32, i32
  }
  func.func @transform_2(%arg0: i32, %arg1: i32) -> (i32, i32) {
    %c0_i32 = arith.constant 0 : i32
    %c0_i32_0 = arith.constant 0 : i32
    %c0_i32_1 = arith.constant 0 : i32
    return %c0_i32, %c0_i32_0 : i32, i32
  }
  func.func @transform_3(%arg0: i32, %arg1: i32) -> (i32, i32) {
    %c0_i32 = arith.constant 0 : i32
    %c0_i32_0 = arith.constant 0 : i32
    %c0_i32_1 = arith.constant 0 : i32
    return %c0_i32, %c0_i32_0 : i32, i32
  }
  func.func @transform_4(%arg0: i32, %arg1: i32) -> (i32, i32) {
    %c0_i32 = arith.constant 0 : i32
    %c0_i32_0 = arith.constant 0 : i32
    %c0_i32_1 = arith.constant 0 : i32
    return %c0_i32, %c0_i32_0 : i32, i32
  }
  func.func @transform_5(%arg0: i32, %arg1: i32) -> (i32, i32) {
    %c0_i32 = arith.constant 0 : i32
    %c0_i32_0 = arith.constant 0 : i32
    %c0_i32_1 = arith.constant 0 : i32
    return %c0_i32, %c0_i32_0 : i32, i32
  }
  func.func @transform_6(%arg0: i32, %arg1: i32) -> (i32, i32, i32) {
    %c0_i32 = arith.constant 0 : i32
    %c0_i32_0 = arith.constant 0 : i32
    return %arg0, %c0_i32, %arg1 : i32, i32, i32
  }
}

</mosaic_0001>

<bundles_post_ra>
// kernel: neural_operator_forward.2
= control target key start
LH: loop header
LB: loop body
LE: loop exit
PB: predicated region body
PF: predicated region fallthrough
CT: control target
= control target key end

     0   :  { %s1022_s9 = smov 0   ;;  %s1118_s0 = inlined_call_operand.vmem [shape: f32[32,2,16], index: 0, kind: input, shape index: {}]   ;;  %s1119_s1 = inlined_call_operand.vmem [shape: f32[32,16,16], index: 1, kind: input, shape index: {}]   ;;  %s1120_s2 = inlined_call_operand.vmem [shape: f32[32,2,16], index: 2, kind: output, shape index: {}]  }
   0x1 LB: > { %s858_s10 = sadd.s32 4294967295, %s1002_s9   ;;  %p862_p0 = scmp.ge.s32.totalorder %s1002_s9, 1  ;;  %s1002_s9 = sphi %s1022_s9, %s12_s9  }
   0x2   : > { %p125_p1 = scmp.lt.s32.totalorder %s1002_s9, 5 }
   0x4   : > { %p126_p2 = pnand %p862_p0, %p125_p1 }
   0x5   : > { %s863_s11 = sshll.u32 (!%p126_p2), %s858_s10, 3  ;;  %v1004_v0 = vmov (!%p126_p2), 0.0|0.0   ;;  %vm1005_vm0 = vmmov (!%p126_p2), 0   ;;  %v1006_v1 = vmov (!%p126_p2), 0.0   ;;  %vm196_vm1 = vcmask (!%p126_p2), 130048  }
   0x6   : > { %129 = sbr.rel (%p126_p2) target bundleno = 248 (0xf8), region = 28  ;;  %961 = vmatprep.subr.bf16.mxu0 (!%p126_p2), %v1004_v0  ;;  %964 = vmatprep.subr.bf16.mxu1 (!%p126_p2), %v1004_v0  ;;  %p154_p3 = scmp.lt.s32.totalorder (!%p126_p2), %s863_s11, 31  ;;  %vm781_vm2 = vcmask (!%p126_p2), 123904  }
   0x7   : > { %909 = vmatprep.mubr.msk.f32.mxu0 (!%p126_p2), %vm1005_vm0, %v1006_v1  ;;  %916 = vmatprep.mubr.msk.f32.mxu1 (!%p126_p2), %vm1005_vm0, %v1006_v1 }
   0xd   : > { %s1122_s11 = smov (!%p154_p3, %s863_s11), 31 }
   0xe   : > { %s880_s12 = sshll.u32 %s1122_s11, 4  ;;  %s864_s13 = sshll.u32 %s1122_s11, 1 }
   0xf   : > { %s1043_s16 = scalar_lea.vmem %s1119_s1, %s880_s12  ;;  %s1053_s19 = scalar_lea.vmem %s1118_s0, %s864_s13 }
  0x10   : > { %v172_v2 = vld [vmem:[%s1043_s16] sm:$0xff]  ;;  %v173_v3 = vld [vmem:[%s1043_s16 + $0x8] sm:$0xff]  ;;  %v174_v4 = vld [vmem:[%s1043_s16 + $0x10] sm:$0xff]  ;;  %s170_s22 = scalar_lea.vmem %s1120_s2, %s864_s13 }
  0x11   : > { %v962_v5 = vpack.c.bf16 %v173_v3, %v172_v2  ;;  %v175_v6 = vld [vmem:[%s1043_s16 + $0x18] sm:$0xff]  ;;  %v176_v8 = vld [vmem:[%s1043_s16 + $0x20] sm:$0xff]  ;;  %v177_v9 = vld [vmem:[%s1043_s16 + $0x28] sm:$0xff] }
  0x12   : > { %v965_v7 = vpack.c.bf16 %v175_v6, %v174_v4  ;;  %v178_v10 = vld [vmem:[%s1043_s16 + $0x30] sm:$0xff]  ;;  %v188_v11 = vld [vmem:[%s1053_s19] sm:$0x3]  ;;  %v968_v12 = vpack.c.bf16 %v177_v9, %v176_v8  ;;  %v179_v13 = vld [vmem:[%s1043_s16 + $0x38] sm:$0xff] }
  0x13   : > { %963 = vmatpush3.bf16.msra.mxu0 %v962_v5  ;;  %v189_v14 = vld [vmem:[%s1053_s19 + $0x2] sm:$0x3]  ;;  %v971_v15 = vpack.c.bf16 %v179_v13, %v178_v10  ;;  %v181_v17 = vld [vmem:[%s1043_s16 + $0x48] sm:$0xff]  ;;  %v182_v18 = vld [vmem:[%s1043_s16 + $0x50] sm:$0xff] }
  0x14   : > { %966 = vmatpush3.bf16.msra.mxu1 %v965_v7  ;;  %967 = vmatprep.subr.bf16.mxu0 %v1004_v0  ;;  %v180_v16 = vld [vmem:[%s1043_s16 + $0x40] sm:$0xff]  ;;  %v183_v19 = vld [vmem:[%s1043_s16 + $0x58] sm:$0xff]  ;;  %v185_v25 = vld [vmem:[%s1043_s16 + $0x68] sm:$0xff] }
  0x15   : > { %970 = vmatprep.subr.bf16.mxu1 %v1004_v0  ;;  %v190_v20 = vld [vmem:[%s1053_s19 + $0x4] sm:$0x3]  ;;  %v974_v21 = vpack.c.bf16 %v181_v17, %v180_v16  ;;  %v191_v22 = vld [vmem:[%s1053_s19 + $0x6] sm:$0x3]  ;;  %v977_v23 = vpack.c.bf16 %v183_v19, %v182_v18  ;;  %v186_v26 = vld [vmem:[%s1043_s16 + $0x70] sm:$0xff] }
  0x16   : > { %910 = vmatmul.mubr.msk.f32.vlgmr.msra.gmra.mrb[0].mxu0 %vm196_vm1, %v188_v11  ;;  %v184_v24 = vld [vmem:[%s1043_s16 + $0x60] sm:$0xff]  ;;  %v187_v27 = vld [vmem:[%s1043_s16 + $0x78] sm:$0xff]  ;;  %v192_v28 = vld [vmem:[%s1053_s19 + $0x8] sm:$0x3] }
  0x17   : > { %917 = vmatmul.mubr.msk.f32.vlgmr.msra.gmra.mrb[0].mxu1 %vm196_vm1, %v189_v14  ;;  %969 = vmatpush3.bf16.msra.mxu0 %v968_v12  ;;  %v980_v29 = vpack.c.bf16 %v185_v25, %v184_v24  ;;  %v193_v30 = vld [vmem:[%s1053_s19 + $0xa] sm:$0x3]  ;;  %v983_v31 = vpack.c.bf16 %v187_v27, %v186_v26  ;;  %v194_v32 = vld [vmem:[%s1053_s19 + $0xc] sm:$0x3]  ;;  %v195_v33 = vld [vmem:[%s1053_s19 + $0xe] sm:$0x3] }
  0x18   : > { %972 = vmatpush3.bf16.msra.mxu1 %v971_v15  ;;  %923 = vmatprep.mubr.msk.f32.mxu0 %vm1005_vm0, %v1006_v1 }
  0x19   : > { %930 = vmatprep.mubr.msk.f32.mxu1 %vm1005_vm0, %v1006_v1  ;;  %973 = vmatprep.subr.bf16.mxu0 %v1004_v0 }
  0x1a   : > { %924 = vmatmul.mubr.msk.f32.vlgmr.msra.gmra.mrb[2].mxu0 %vm196_vm1, %v190_v20  ;;  %976 = vmatprep.subr.bf16.mxu1 %v1004_v0 }
  0x1b   : > { %931 = vmatmul.mubr.msk.f32.vlgmr.msra.gmra.mrb[2].mxu1 %vm196_vm1, %v191_v22  ;;  %975 = vmatpush3.bf16.msra.mxu0 %v974_v21 }
  0x1c   : > { %978 = vmatpush3.bf16.msra.mxu1 %v977_v23  ;;  %937 = vmatprep.mubr.msk.f32.mxu0 %vm1005_vm0, %v1006_v1 }
  0x1d   : > { %944 = vmatprep.mubr.msk.f32.mxu1 %vm1005_vm0, %v1006_v1  ;;  %979 = vmatprep.subr.bf16.mxu0 %v1004_v0 }
  0x1e   : > { %938 = vmatmul.mubr.msk.f32.vlgmr.msra.gmra.mrb[4].mxu0 %vm196_vm1, %v192_v28  ;;  %982 = vmatprep.subr.bf16.mxu1 %v1004_v0 }
  0x1f   : > { %945 = vmatmul.mubr.msk.f32.vlgmr.msra.gmra.mrb[4].mxu1 %vm196_vm1, %v193_v30  ;;  %981 = vmatpush3.bf16.msra.mxu0 %v980_v29 }
  0x20   : > { %984 = vmatpush3.bf16.msra.mxu1 %v983_v31  ;;  %951 = vmatprep.mubr.msk.f32.mxu0 %vm1005_vm0, %v1006_v1 }
  0x21   : > { %958 = vmatprep.mubr.msk.f32.mxu1 %vm1005_vm0, %v1006_v1 }
  0x22   : > { %952 = vmatmul.mubr.msk.f32.vlgmr.msra.gmra.mrb[6].mxu0 %vm196_vm1, %v194_v32 }
  0x23   : > { %959 = vmatmul.mubr.msk.f32.vlgmr.msra.gmra.mrb[6].mxu1 %vm196_vm1, %v195_v33 }
  0xe9   : > { %v266_v34 = vpop.f32.mrb[0].mxu0 }
  0xea   : > { %782 = vst.msk [vmem:[%s170_s22] sm:$0x3] %vm781_vm2, %v266_v34  ;;  %v339_v35 = vpop.f32.mrb[0].mxu1  ;;  %v911_v36 = vpop.f32.mrb[1].mxu0 }
  0xeb   : > { %783 = vst.msk [vmem:[%s170_s22 + $0x2] sm:$0x3] %vm781_vm2, %v339_v35  ;;  %v918_v37 = vpop.f32.mrb[1].mxu1 }
  0xed   : > { %v412_v38 = vpop.f32.mrb[2].mxu0 }
  0xee   : > { %784 = vst.msk [vmem:[%s170_s22 + $0x4] sm:$0x3] %vm781_vm2, %v412_v38  ;;  %v485_v39 = vpop.f32.mrb[2].mxu1  ;;  %v925_v40 = vpop.f32.mrb[3].mxu0 }
  0xef   : > { %785 = vst.msk [vmem:[%s170_s22 + $0x6] sm:$0x3] %vm781_vm2, %v485_v39  ;;  %v932_v41 = vpop.f32.mrb[3].mxu1 }
  0xf1   : > { %v558_v42 = vpop.f32.mrb[4].mxu0 }
  0xf2   : > { %786 = vst.msk [vmem:[%s170_s22 + $0x8] sm:$0x3] %vm781_vm2, %v558_v42  ;;  %v631_v43 = vpop.f32.mrb[4].mxu1  ;;  %v939_v44 = vpop.f32.mrb[5].mxu0 }
  0xf3   : > { %787 = vst.msk [vmem:[%s170_s22 + $0xa] sm:$0x3] %vm781_vm2, %v631_v43  ;;  %v946_v45 = vpop.f32.mrb[5].mxu1 }
  0xf5   : > { %v704_v46 = vpop.f32.mrb[6].mxu0 }
  0xf6   : > { %788 = vst.msk [vmem:[%s170_s22 + $0xc] sm:$0x3] %vm781_vm2, %v704_v46  ;;  %v777_v47 = vpop.f32.mrb[6].mxu1  ;;  %v953_v48 = vpop.f32.mrb[7].mxu0 }
  0xf7   : > { %789 = vst.msk [vmem:[%s170_s22 + $0xe] sm:$0x3] %vm781_vm2, %v777_v47  ;;  %v960_v49 = vpop.f32.mrb[7].mxu1 }
  0xf8 PF: > { %s12_s9 = sadd.s32 1, %s1002_s9  }
  0xf9   : > { %p9_p4 = scmp.ge.s32.totalorder %s12_s9, 6  }
  0xfb   :  { %11 = sbr.rel (!%p9_p4) target bundleno = 1 (0x1), region = 61 }

// kernel: reverse.0
= control target key start
LH: loop header
LB: loop body
LE: loop exit
PB: predicated region body
PF: predicated region fallthrough
CT: control target
= control target key end

     0   :  { %v103_v3 = vlaneseq  ;;  %v96_v18 = vld [vmem:[#allocation0 + $0x7] ss:$-1 sm:$0xff]  ;;  %v110_v19 = vld [vmem:[#allocation0 + $0x17] ss:$-1 sm:$0xff]  ;;  %s604_s0 = inlined_call_operand.vmem [shape: f32[2,8,16,7], index: 0, kind: input, shape index: {}]   ;;  %s605_s1 = inlined_call_operand.vmem [shape: f32[2,8,16,7], index: 1, kind: output, shape index: {}]  }
   0x1   :  { %v60_v0 = vld [vmem:[%s604_s0] sm:$0xff]  ;;  %v62_v1 = vld [vmem:[%s604_s0 + $0x8] sm:$0xff]  ;;  %v64_v2 = vld [vmem:[%s604_s0 + $0x10] sm:$0xff]  ;;  %v97_v20 = vrot.slane %v96_v18, 1  ;;  %v111_v21 = vrot.slane %v110_v19, 1 }
   0x2   :  { %61 = vst [vmem:[#allocation0 + $0x8] sm:$0xff] %v60_v0  ;;  %63 = vst [vmem:[#allocation0 + $0x18] sm:$0xff] %v62_v1  ;;  %v66_v4 = vld [vmem:[%s604_s0 + $0x18] sm:$0xff]  ;;  %v68_v5 = vld [vmem:[%s604_s0 + $0x20] sm:$0xff]  ;;  %v500_v10 = vshrl.u32 %v103_v3, 7 }
   0x3   :  { %65 = vst [vmem:[#allocation0 + $0x28] sm:$0xff] %v64_v2  ;;  %v70_v6 = vld [vmem:[%s604_s0 + $0x28] sm:$0xff]  ;;  %67 = vst [vmem:[#allocation0 + $0x38] sm:$0xff] %v66_v4  ;;  %v72_v7 = vld [vmem:[%s604_s0 + $0x30] sm:$0xff] }
   0x4   :  { %69 = vst [vmem:[#allocation0 + $0x48] sm:$0xff] %v68_v5  ;;  %71 = vst [vmem:[#allocation0 + $0x58] sm:$0xff] %v70_v6  ;;  %v74_v8 = vld [vmem:[%s604_s0 + $0x38] sm:$0xff]  ;;  %v76_v9 = vld [vmem:[%s604_s0 + $0x40] sm:$0xff]  ;;  %vm105_vm0 = vcmp.lt.s32.totalorder %v500_v10, 7 }
   0x5   :  { %73 = vst [vmem:[#allocation0 + $0x68] sm:$0xff] %v72_v7  ;;  %75 = vst [vmem:[#allocation0 + $0x78] sm:$0xff] %v74_v8  ;;  %v78_v11 = vld [vmem:[%s604_s0 + $0x48] sm:$0xff]  ;;  %v80_v12 = vld [vmem:[%s604_s0 + $0x50] sm:$0xff] }
   0x6   :  { %77 = vst [vmem:[#allocation0 + $0x88] sm:$0xff] %v76_v9  ;;  %v82_v13 = vld [vmem:[%s604_s0 + $0x58] sm:$0xff]  ;;  %79 = vst [vmem:[#allocation0 + $0x98] sm:$0xff] %v78_v11  ;;  %v84_v14 = vld [vmem:[%s604_s0 + $0x60] sm:$0xff] }
   0x7   :  { %81 = vst [vmem:[#allocation0 + $0xa8] sm:$0xff] %v80_v12  ;;  %83 = vst [vmem:[#allocation0 + $0xb8] sm:$0xff] %v82_v13  ;;  %v86_v15 = vld [vmem:[%s604_s0 + $0x68] sm:$0xff]  ;;  %v88_v16 = vld [vmem:[%s604_s0 + $0x70] sm:$0xff] }
   0x8   :  { %85 = vst [vmem:[#allocation0 + $0xc8] sm:$0xff] %v84_v14  ;;  %87 = vst [vmem:[#allocation0 + $0xd8] sm:$0xff] %v86_v15  ;;  %v90_v17 = vld [vmem:[%s604_s0 + $0x78] sm:$0xff]  ;;  %v124_v22 = vld [vmem:[#allocation0 + $0x27] ss:$-1 sm:$0xff] }
   0x9   :  { %89 = vst [vmem:[#allocation0 + $0xe8] sm:$0xff] %v88_v16  ;;  %91 = vst [vmem:[#allocation0 + $0xf8] sm:$0xff] %v90_v17  ;;  %v138_v23 = vld [vmem:[#allocation0 + $0x37] ss:$-1 sm:$0xff]  ;;  %v125_v24 = vrot.slane %v124_v22, 1 }
   0xa   :  { %v139_v25 = vrot.slane %v138_v23, 1  ;;  %v152_v26 = vld [vmem:[#allocation0 + $0x47] ss:$-1 sm:$0xff]  ;;  %v166_v27 = vld [vmem:[#allocation0 + $0x57] ss:$-1 sm:$0xff]  ;;  %98 = vst [vmem:[#allocation1] sm:$0xff] %v97_v20 }
   0xb   :  { %v101_v28 = vld [vmem:[#allocation0 + $0xf] ss:$-1 sm:$0xff]  ;;  %112 = vst [vmem:[#allocation1 + $0x8] sm:$0xff] %v111_v21  ;;  %v115_v29 = vld [vmem:[#allocation0 + $0x1f] ss:$-1 sm:$0xff]  ;;  %126 = vst [vmem:[#allocation1 + $0x10] sm:$0xff] %v125_v24 }
   0xc   :  { %v129_v30 = vld [vmem:[#allocation0 + $0x2f] ss:$-1 sm:$0xff]  ;;  %v102_v31 = vrot.slane %v101_v28, 1  ;;  %v116_v32 = vrot.slane %v115_v29, 1  ;;  %140 = vst [vmem:[#allocation1 + $0x18] sm:$0xff] %v139_v25  ;;  %v153_v35 = vrot.slane %v152_v26, 1 }
   0xd   :  { %v130_v33 = vrot.slane %v129_v30, 1  ;;  %v143_v34 = vld [vmem:[#allocation0 + $0x3f] ss:$-1 sm:$0xff]  ;;  %v157_v37 = vld [vmem:[#allocation0 + $0x4f] ss:$-1 sm:$0xff]  ;;  %v167_v38 = vrot.slane %v166_v27, 1 }
   0xe   :  { %v144_v36 = vrot.slane %v143_v34, 1  ;;  %v171_v39 = vld [vmem:[#allocation0 + $0x5f] ss:$-1 sm:$0xff]  ;;  %106 = vst.msk [vmem:[#allocation1] sm:$0xff] %vm105_vm0, %v102_v31  ;;  %120 = vst.msk [vmem:[#allocation1 + $0x8] sm:$0xff] %vm105_vm0, %v116_v32  ;;  %v158_v40 = vrot.slane %v157_v37, 1 }
   0xf   :  { %134 = vst.msk [vmem:[#allocation1 + $0x10] sm:$0xff] %vm105_vm0, %v130_v33  ;;  %154 = vst [vmem:[#allocation1 + $0x20] sm:$0xff] %v153_v35  ;;  %v172_v41 = vrot.slane %v171_v39, 1  ;;  %v180_v42 = vld [vmem:[#allocation0 + $0x67] ss:$-1 sm:$0xff] }
  0x10   :  { %v185_v43 = vld [vmem:[#allocation0 + $0x6f] ss:$-1 sm:$0xff]  ;;  %148 = vst.msk [vmem:[#allocation1 + $0x18] sm:$0xff] %vm105_vm0, %v144_v36  ;;  %168 = vst [vmem:[#allocation1 + $0x28] sm:$0xff] %v167_v38  ;;  %v181_v44 = vrot.slane %v180_v42, 1 }
  0x11   :  { %v186_v45 = vrot.slane %v185_v43, 1  ;;  %v194_v46 = vld [vmem:[#allocation0 + $0x77] ss:$-1 sm:$0xff]  ;;  %v199_v47 = vld [vmem:[#allocation0 + $0x7f] ss:$-1 sm:$0xff]  ;;  %162 = vst.msk [vmem:[#allocation1 + $0x20] sm:$0xff] %vm105_vm0, %v158_v40 }
  0x12   :  { %176 = vst.msk [vmem:[#allocation1 + $0x28] sm:$0xff] %vm105_vm0, %v172_v41  ;;  %v195_v48 = vrot.slane %v194_v46, 1  ;;  %v200_v49 = vrot.slane %v199_v47, 1  ;;  %v208_v50 = vld [vmem:[#allocation0 + $0x87] ss:$-1 sm:$0xff]  ;;  %182 = vst [vmem:[#allocation1 + $0x30] sm:$0xff] %v181_v44 }
  0x13   :  { %v213_v51 = vld [vmem:[#allocation0 + $0x8f] ss:$-1 sm:$0xff]  ;;  %v209_v52 = vrot.slane %v208_v50, 1  ;;  %v222_v54 = vld [vmem:[#allocation0 + $0x97] ss:$-1 sm:$0xff]  ;;  %190 = vst.msk [vmem:[#allocation1 + $0x30] sm:$0xff] %vm105_vm0, %v186_v45 }
  0x14   :  { %v214_v53 = vrot.slane %v213_v51, 1  ;;  %v227_v55 = vld [vmem:[#allocation0 + $0x9f] ss:$-1 sm:$0xff]  ;;  %196 = vst [vmem:[#allocation1 + $0x38] sm:$0xff] %v195_v48  ;;  %v223_v56 = vrot.slane %v222_v54, 1 }
  0x15   :  { %v228_v57 = vrot.slane %v227_v55, 1  ;;  %v236_v58 = vld [vmem:[#allocation0 + $0xa7] ss:$-1 sm:$0xff]  ;;  %v241_v59 = vld [vmem:[#allocation0 + $0xaf] ss:$-1 sm:$0xff]  ;;  %204 = vst.msk [vmem:[#allocation1 + $0x38] sm:$0xff] %vm105_vm0, %v200_v49 }
  0x16   :  { %210 = vst [vmem:[#allocation1 + $0x40] sm:$0xff] %v209_v52  ;;  %v237_v60 = vrot.slane %v236_v58, 1  ;;  %v242_v61 = vrot.slane %v241_v59, 1  ;;  %v250_v62 = vld [vmem:[#allocation0 + $0xb7] ss:$-1 sm:$0xff]  ;;  %224 = vst [vmem:[#allocation1 + $0x48] sm:$0xff] %v223_v56 }
  0x17   :  { %v255_v63 = vld [vmem:[#allocation0 + $0xbf] ss:$-1 sm:$0xff]  ;;  %218 = vst.msk [vmem:[#allocation1 + $0x40] sm:$0xff] %vm105_vm0, %v214_v53  ;;  %v251_v0 = vrot.slane %v250_v62, 1  ;;  %v264_v2 = vld [vmem:[#allocation0 + $0xc7] ss:$-1 sm:$0xff] }
  0x18   :  { %v256_v1 = vrot.slane %v255_v63, 1  ;;  %v269_v3 = vld [vmem:[#allocation0 + $0xcf] ss:$-1 sm:$0xff]  ;;  %232 = vst.msk [vmem:[#allocation1 + $0x48] sm:$0xff] %vm105_vm0, %v228_v57  ;;  %238 = vst [vmem:[#allocation1 + $0x50] sm:$0xff] %v237_v60  ;;  %v265_v4 = vrot.slane %v264_v2, 1 }
  0x19   :  { %v270_v5 = vrot.slane %v269_v3, 1  ;;  %v278_v6 = vld [vmem:[#allocation0 + $0xd7] ss:$-1 sm:$0xff]  ;;  %v283_v7 = vld [vmem:[#allocation0 + $0xdf] ss:$-1 sm:$0xff]  ;;  %246 = vst.msk [vmem:[#allocation1 + $0x50] sm:$0xff] %vm105_vm0, %v242_v61 }
  0x1a   :  { %252 = vst [vmem:[#allocation1 + $0x58] sm:$0xff] %v251_v0  ;;  %v279_v8 = vrot.slane %v278_v6, 1  ;;  %v284_v9 = vrot.slane %v283_v7, 1  ;;  %v292_v11 = vld [vmem:[#allocation0 + $0xe7] ss:$-1 sm:$0xff]  ;;  %266 = vst [vmem:[#allocation1 + $0x60] sm:$0xff] %v265_v4 }
  0x1b   :  { %v297_v12 = vld [vmem:[#allocation0 + $0xef] ss:$-1 sm:$0xff]  ;;  %260 = vst.msk [vmem:[#allocation1 + $0x58] sm:$0xff] %vm105_vm0, %v256_v1  ;;  %v293_v13 = vrot.slane %v292_v11, 1  ;;  %v306_v15 = vld [vmem:[#allocation0 + $0xf7] ss:$-1 sm:$0xff] }
  0x1c   :  { %v298_v14 = vrot.slane %v297_v12, 1  ;;  %v311_v16 = vld [vmem:[#allocation0 + $0xff] ss:$-1 sm:$0xff]  ;;  %274 = vst.msk [vmem:[#allocation1 + $0x60] sm:$0xff] %vm105_vm0, %v270_v5  ;;  %280 = vst [vmem:[#allocation1 + $0x68] sm:$0xff] %v279_v8  ;;  %v307_v17 = vrot.slane %v306_v15, 1 }
  0x1d   :  { %v312_v18 = vrot.slane %v311_v16, 1  ;;  %v374_v19 = vld [vmem:[#allocation1] sm:$0xff]  ;;  %v376_v20 = vld [vmem:[#allocation1 + $0x8] sm:$0xff]  ;;  %v378_v21 = vld [vmem:[#allocation1 + $0x10] sm:$0xff]  ;;  %288 = vst.msk [vmem:[#allocation1 + $0x68] sm:$0xff] %vm105_vm0, %v284_v9 }
  0x1e   :  { %294 = vst [vmem:[#allocation1 + $0x70] sm:$0xff] %v293_v13  ;;  %375 = vst [vmem:[%s605_s1] sm:$0xff] %v374_v19  ;;  %v380_v22 = vld [vmem:[#allocation1 + $0x18] sm:$0xff]  ;;  %v382_v23 = vld [vmem:[#allocation1 + $0x20] sm:$0xff] }
  0x1f   :  { %377 = vst [vmem:[%s605_s1 + $0x8] sm:$0xff] %v376_v20  ;;  %379 = vst [vmem:[%s605_s1 + $0x10] sm:$0xff] %v378_v21  ;;  %v384_v24 = vld [vmem:[#allocation1 + $0x28] sm:$0xff]  ;;  %v386_v25 = vld [vmem:[#allocation1 + $0x30] sm:$0xff] }
  0x20   :  { %302 = vst.msk [vmem:[#allocation1 + $0x70] sm:$0xff] %vm105_vm0, %v298_v14  ;;  %308 = vst [vmem:[#allocation1 + $0x78] sm:$0xff] %v307_v17  ;;  %v388_v26 = vld [vmem:[#allocation1 + $0x38] sm:$0xff]  ;;  %v390_v10 = vld [vmem:[#allocation1 + $0x40] sm:$0xff] }
  0x21   :  { %381 = vst [vmem:[%s605_s1 + $0x18] sm:$0xff] %v380_v22  ;;  %383 = vst [vmem:[%s605_s1 + $0x20] sm:$0xff] %v382_v23  ;;  %v392_v27 = vld [vmem:[#allocation1 + $0x48] sm:$0xff]  ;;  %v394_v28 = vld [vmem:[#allocation1 + $0x50] sm:$0xff] }
  0x22   :  { %385 = vst [vmem:[%s605_s1 + $0x28] sm:$0xff] %v384_v24  ;;  %316 = vst.msk [vmem:[#allocation1 + $0x78] sm:$0xff] %vm105_vm0, %v312_v18  ;;  %v396_v29 = vld [vmem:[#allocation1 + $0x58] sm:$0xff] }
  0x23   :  { %387 = vst [vmem:[%s605_s1 + $0x30] sm:$0xff] %v386_v25  ;;  %389 = vst [vmem:[%s605_s1 + $0x38] sm:$0xff] %v388_v26  ;;  %v398_v30 = vld [vmem:[#allocation1 + $0x60] sm:$0xff] }
  0x24   :  { %391 = vst [vmem:[%s605_s1 + $0x40] sm:$0xff] %v390_v10  ;;  %393 = vst [vmem:[%s605_s1 + $0x48] sm:$0xff] %v392_v27  ;;  %v400_v31 = vld [vmem:[#allocation1 + $0x68] sm:$0xff] }
  0x25   :  { %395 = vst [vmem:[%s605_s1 + $0x50] sm:$0xff] %v394_v28  ;;  %397 = vst [vmem:[%s605_s1 + $0x58] sm:$0xff] %v396_v29 }
  0x26   :  { %399 = vst [vmem:[%s605_s1 + $0x60] sm:$0xff] %v398_v30  ;;  %401 = vst [vmem:[%s605_s1 + $0x68] sm:$0xff] %v400_v31 }
  0x27   :  { %v402_v32 = vld [vmem:[#allocation1 + $0x70] sm:$0xff] }
  0x28   :  { %403 = vst [vmem:[%s605_s1 + $0x70] sm:$0xff] %v402_v32 }
  0x29   :  { %v404_v33 = vld [vmem:[#allocation1 + $0x78] sm:$0xff] }
  0x2a   :  { %405 = vst [vmem:[%s605_s1 + $0x78] sm:$0xff] %v404_v33 }

// kernel: neural_operator_forward.3
= control target key start
LH: loop header
LB: loop body
LE: loop exit
PB: predicated region body
PF: predicated region fallthrough
CT: control target
= control target key end

     0   :  { %s844_s21 = smov 0   ;;  %s846_s22 = smov 0   ;;  %s897_s0 = inlined_call_operand.vmem [shape: f32[2,8,256], index: 0, kind: input, shape index: {}]   ;;  %s898_s1 = inlined_call_operand.vmem [shape: f32[2,8,256], index: 1, kind: input, shape index: {}]   ;;  %s899_s2 = inlined_call_operand.vmem [shape: f32[8,8], index: 2, kind: input, shape index: {}]   ;;  %s900_s3 = inlined_call_operand.vmem [shape: f32[8,1], index: 3, kind: input, shape index: {}]   ;;  %s901_s4 = inlined_call_operand.vmem [shape: f32[8,16], index: 4, kind: input, shape index: {}]   ;;  %s902_s5 = inlined_call_operand.vmem [shape: f32[8,1], index: 5, kind: input, shape index: {}]   ;;  %s903_s6 = inlined_call_operand.vmem [shape: f32[2,8,256], index: 6, kind: output, shape index: {}]  }
   0x1   :  { %s848_s23 = smov 0  }
   0x2 LB: > { %s28_s24 = sadd.s32 1, %s801_s22  ;;  %p722_p0 = scmp.ge.s32.totalorder %s805_s23, 1  ;;  %s805_s23 = sphi %s848_s23, %s16_s23   ;;  %s801_s22 = sphi %s846_s22, %s905_s22   ;;  %s797_s21 = sphi %s844_s21, %s904_s21  }
   0x3   : > { %p30_p1 = scmp.ge.s32.totalorder %s28_s24, 2  ;;  %p250_p2 = scmp.lt.s32.totalorder %s805_s23, 3 }
   0x5   : > { %s907_s24 = smov (%p30_p1, %s28_s24), 0  ;;  %p251_p3 = pnand %p722_p0, %p250_p2 }
   0x6   : > { %p298_p4 = scmp.lt.s32.totalorder (!%p251_p3), %s797_s21, 1  ;;  %v332_v0 = vld [vmem:[%s900_s3] sm:$0xff] (!%p251_p3)  ;;  %v807_v1 = vmov (!%p251_p3), 0.0   ;;  %v808_v2 = vmov (!%p251_p3), 0   ;;  %vm338_vm0 = vcmask (!%p251_p3), 64512   ;;  %vm478_vm3 = vcmask (!%p251_p3), 130048  }
   0x7   : > { %254 = sbr.rel (%p251_p3) target bundleno = 565 (0x235), region = 44  ;;  %406 = vmatprep.mubr.f32.mxu0 (!%p251_p3), %v807_v1  ;;  %766 = vset.pattern.permute.xlu0 (!%p251_p3), %v808_v2  ;;  %v472_v3 = vld [vmem:[%s902_s5] sm:$0xff] (!%p251_p3) }
   0x8   : > { %335 = vperm.xlu0 (!%p251_p3), %766, %v332_v0   ;;  %546 = vmatprep.mubr.f32.mxu1 (!%p251_p3), %v807_v1  ;;  %v331_v6 = vld [vmem:[%s899_s2] sm:$0xff] (!%p251_p3) }
   0xc   : > { %475 = vperm.xlu0 (!%p251_p3), %766, %v472_v3  }
   0xe   : > { %s909_s21 = smov (!%p298_p4, %s797_s21), 1 }
   0xf   : > { %s868_s29 = sshll.u32 %s909_s21, 4 }
  0x10   : > { %s305_s8 = scalar_lea.vmem %s897_s0, %s868_s29  ;;  %s315_s13 = scalar_lea.vmem %s898_s1, %s868_s29 }
  0x11   : > { %v328_v4 = vld [vmem:[%s305_s8 + $0x8] sm:$0xff]  ;;  %v327_v5 = vld [vmem:[%s305_s8] sm:$0xff]  ;;  %s325_s18 = scalar_lea.vmem %s903_s6, %s868_s29 }
  0x12   : > { %342 = vmatprep.subr.mxu0 %v328_v4  ;;  %v330_v2 = vld [vmem:[%s315_s13 + $0x8] sm:$0xff] }
  0x13   : > { %343 = vmatpush1.msra.mxu0 %v327_v5  ;;  %v329_v5 = vld [vmem:[%s315_s13] sm:$0xff] }
  0x14   : > { %729 = vmatmul.mubr.msk.f32.vlgmr.msra.gmra.mrb[0].mxu0 %vm338_vm0, %v331_v6 }
  0x87   : > { %v336_v7 = vpop.permute.xlu0 %335 }
  0xe7   : > { %v408_v8 = vpop.f32.mrb[0].mxu0 }
  0xe8   : > { %v409_v9 = vadd.f32 %v408_v8, %v336_v7  ;;  %v410_v10 = vpop.f32.mrb[1].mxu0  ;;  %v471_v8 = vld [vmem:[%s901_s4] sm:$0xff] }
  0xe9   : > { %v411_v11 = vadd.f32 %v410_v10, %v336_v7  ;;  %v476_v10 = vpop.permute.xlu0 %475 }
  0xea   : > { %v415_v12 = vmul.f32 0.70710677, %v409_v9  ;;  %v413_v61 = vmul.f32 0.5, %v409_v9 }
  0xeb   : > { %v416_v13 = vmul.f32 0.70710677, %v411_v11  ;;  %v414_v0 = vmul.f32 0.5, %v411_v11 }
  0xec   : > { %v417_v14 = vand.u32 2147483647, %v415_v12  ;;  %vm461_vm1 = vcmp.ge.f32.partialorder %v415_v12, 0.0 }
  0xed   : > { %v418_v15 = vand.u32 2147483647, %v416_v13  ;;  %vm462_vm2 = vcmp.ge.f32.partialorder %v416_v13, 0.0 }
  0xee   : > { %v419_v16 = vmul.f32 0.3275911, %v417_v14  ;;  %v449_v23 = vsub.f32 0.0, %v417_v14 }
  0xef   : > { %v420_v17 = vmul.f32 0.3275911, %v418_v15  ;;  %v450_v26 = vsub.f32 0.0, %v418_v15 }
  0xf0   : > { %v421_v18 = vadd.f32 1.0, %v419_v16  ;;  %v451_v29 = vmul.f32 %v449_v23, %v417_v14 }
  0xf1   : > { %v422_v19 = vadd.f32 1.0, %v420_v17  ;;  %v452_v31 = vmul.f32 %v450_v26, %v418_v15 }
  0xf2   : > { %767 = vrcp.f32 %v421_v18  ;;  %v453_v35 = vmul.f32 1.442695, %v451_v29 }
  0xf3   : > { %769 = vrcp.f32 %v422_v19  ;;  %v455_v37 = vmul.f32 1.442695, %v452_v31 }
  0xf4   : > { %771 = vpow2.f32 %v453_v35 }
  0xf5   : > { %773 = vpow2.f32 %v455_v37 }
  0xfc   : > { %v768_v20 = vpop.eup %767 }
  0xfd   : > { %v770_v21 = vpop.eup %769  ;;  %v425_v22 = vmul.f32 %v768_v20, %v421_v18 }
  0xfe   : > { %v426_v24 = vmul.f32 %v770_v21, %v422_v19  ;;  %v772_v51 = vpop.eup %771 }
  0xff   : > { %v427_v25 = vsub.f32 2.0, %v425_v22  ;;  %v774_v53 = vpop.eup %773 }
 0x100   : > { %v428_v27 = vsub.f32 2.0, %v426_v24 }
 0x101   : > { %v429_v28 = vmul.f32 %v768_v20, %v427_v25 }
 0x102   : > { %v430_v30 = vmul.f32 %v770_v21, %v428_v27 }
 0x103   : > { %v431_v32 = vmul.f32 1.0614054, %v429_v28 }
 0x104   : > { %v432_v33 = vmul.f32 1.0614054, %v430_v30 }
 0x105   : > { %v433_v34 = vadd.f32 -1.4531521, %v431_v32 }
 0x106   : > { %v434_v36 = vadd.f32 -1.4531521, %v432_v33 }
 0x107   : > { %v435_v38 = vmul.f32 %v433_v34, %v429_v28 }
 0x108   : > { %v436_v39 = vmul.f32 %v434_v36, %v430_v30 }
 0x109   : > { %v437_v40 = vadd.f32 1.4214138, %v435_v38 }
 0x10a   : > { %v438_v41 = vadd.f32 1.4214138, %v436_v39 }
 0x10b   : > { %v439_v42 = vmul.f32 %v437_v40, %v429_v28 }
 0x10c   : > { %v440_v43 = vmul.f32 %v438_v41, %v430_v30 }
 0x10d   : > { %v441_v44 = vadd.f32 -0.28449672, %v439_v42 }
 0x10e   : > { %v442_v45 = vadd.f32 -0.28449672, %v440_v43 }
 0x10f   : > { %v443_v46 = vmul.f32 %v441_v44, %v429_v28 }
 0x110   : > { %v444_v47 = vmul.f32 %v442_v45, %v430_v30 }
 0x111   : > { %v445_v48 = vadd.f32 0.2548296, %v443_v46 }
 0x112   : > { %v446_v49 = vadd.f32 0.2548296, %v444_v47 }
 0x113   : > { %v447_v50 = vmul.f32 %v445_v48, %v429_v28 }
 0x114   : > { %v448_v52 = vmul.f32 %v446_v49, %v430_v30 }
 0x115   : > { %v457_v54 = vmul.f32 %v772_v51, %v447_v50 }
 0x116   : > { %v458_v55 = vmul.f32 %v774_v53, %v448_v52 }
 0x117   : > { %v459_v56 = vsub.f32 1.0, %v457_v54 }
 0x118   : > { %v460_v57 = vsub.f32 1.0, %v458_v55 }
 0x119   : > { %v463_v58 = vsub.f32 0.0, %v459_v56 }
 0x11a   : > { %v464_v59 = vsub.f32 0.0, %v460_v57 }
 0x11b   : > { %v465_v60 = vsel %vm461_vm1, %v459_v56, %v463_v58 }
 0x11c   : > { %v466_v62 = vsel %vm462_vm2, %v460_v57, %v464_v59  ;;  %v467_v63 = vadd.f32 1.0, %v465_v60 }
 0x11d   : > { %v468_v1 = vadd.f32 1.0, %v466_v62 }
 0x11e   : > { %v469_v3 = vmul.f32 %v467_v63, %v413_v61 }
 0x11f   : > { %v470_v4 = vmul.f32 %v468_v1, %v414_v0 }
 0x120   : > { %v738_v7 = vpack.c.bf16 %v329_v5, %v469_v3 }
 0x121   : > { %v736_v6 = vpack.c.bf16 %v330_v2, %v470_v4 }
 0x123   : > { %737 = vmatprep.subr.bf16.mxu1 %v736_v6 }
 0x124   : > { %739 = vmatpush1.bf16.msra.mxu1 %v738_v7 }
 0x127   : > { %730 = vmatmul.mubr.msk.f32.vlgmr.msra.gmra.mrb[0].mxu1 %vm478_vm3, %v471_v8 }
 0x1fa   : > { %v548_v9 = vpop.f32.mrb[0].mxu1 }
 0x1fb   : > { %v549_v12 = vadd.f32 %v548_v9, %v476_v10  ;;  %v550_v13 = vpop.f32.mrb[1].mxu1 }
 0x1fc   : > { %v551_v11 = vadd.f32 %v550_v13, %v476_v10 }
 0x1fd   : > { %v555_v14 = vmul.f32 0.70710677, %v549_v12  ;;  %v553_v63 = vmul.f32 0.5, %v549_v12 }
 0x1fe   : > { %v556_v15 = vmul.f32 0.70710677, %v551_v11  ;;  %v554_v2 = vmul.f32 0.5, %v551_v11 }
 0x1ff   : > { %v557_v16 = vand.u32 2147483647, %v555_v14  ;;  %vm601_vm4 = vcmp.ge.f32.partialorder %v555_v14, 0.0 }
 0x200   : > { %v558_v17 = vand.u32 2147483647, %v556_v15  ;;  %vm602_vm5 = vcmp.ge.f32.partialorder %v556_v15, 0.0 }
 0x201   : > { %v559_v18 = vmul.f32 0.3275911, %v557_v16  ;;  %v589_v25 = vsub.f32 0.0, %v557_v16 }
 0x202   : > { %v560_v19 = vmul.f32 0.3275911, %v558_v17  ;;  %v590_v28 = vsub.f32 0.0, %v558_v17 }
 0x203   : > { %v561_v20 = vadd.f32 1.0, %v559_v18  ;;  %v591_v31 = vmul.f32 %v589_v25, %v557_v16 }
 0x204   : > { %v562_v21 = vadd.f32 1.0, %v560_v19  ;;  %v592_v34 = vmul.f32 %v590_v28, %v558_v17 }
 0x205   : > { %775 = vrcp.f32 %v561_v20  ;;  %v593_v37 = vmul.f32 1.442695, %v591_v31 }
 0x206   : > { %777 = vrcp.f32 %v562_v21  ;;  %v595_v40 = vmul.f32 1.442695, %v592_v34 }
 0x207   : > { %779 = vpow2.f32 %v593_v37 }
 0x208   : > { %781 = vpow2.f32 %v595_v40 }
 0x20f   : > { %v776_v22 = vpop.eup %775 }
 0x210   : > { %v778_v23 = vpop.eup %777  ;;  %v565_v24 = vmul.f32 %v776_v22, %v561_v20 }
 0x211   : > { %v566_v26 = vmul.f32 %v778_v23, %v562_v21  ;;  %v780_v53 = vpop.eup %779 }
 0x212   : > { %v567_v27 = vsub.f32 2.0, %v565_v24  ;;  %v782_v55 = vpop.eup %781 }
 0x213   : > { %v568_v29 = vsub.f32 2.0, %v566_v26 }
 0x214   : > { %v569_v30 = vmul.f32 %v776_v22, %v567_v27 }
 0x215   : > { %v570_v32 = vmul.f32 %v778_v23, %v568_v29 }
 0x216   : > { %v571_v33 = vmul.f32 1.0614054, %v569_v30 }
 0x217   : > { %v572_v35 = vmul.f32 1.0614054, %v570_v32 }
 0x218   : > { %v573_v36 = vadd.f32 -1.4531521, %v571_v33 }
 0x219   : > { %v574_v38 = vadd.f32 -1.4531521, %v572_v35 }
 0x21a   : > { %v575_v39 = vmul.f32 %v573_v36, %v569_v30 }
 0x21b   : > { %v576_v41 = vmul.f32 %v574_v38, %v570_v32 }
 0x21c   : > { %v577_v42 = vadd.f32 1.4214138, %v575_v39 }
 0x21d   : > { %v578_v43 = vadd.f32 1.4214138, %v576_v41 }
 0x21e   : > { %v579_v44 = vmul.f32 %v577_v42, %v569_v30 }
 0x21f   : > { %v580_v45 = vmul.f32 %v578_v43, %v570_v32 }
 0x220   : > { %v581_v46 = vadd.f32 -0.28449672, %v579_v44 }
 0x221   : > { %v582_v47 = vadd.f32 -0.28449672, %v580_v45 }
 0x222   : > { %v583_v48 = vmul.f32 %v581_v46, %v569_v30 }
 0x223   : > { %v584_v49 = vmul.f32 %v582_v47, %v570_v32 }
 0x224   : > { %v585_v50 = vadd.f32 0.2548296, %v583_v48 }
 0x225   : > { %v586_v51 = vadd.f32 0.2548296, %v584_v49 }
 0x226   : > { %v587_v52 = vmul.f32 %v585_v50, %v569_v30 }
 0x227   : > { %v588_v54 = vmul.f32 %v586_v51, %v570_v32 }
 0x228   : > { %v597_v56 = vmul.f32 %v780_v53, %v587_v52 }
 0x229   : > { %v598_v57 = vmul.f32 %v782_v55, %v588_v54 }
 0x22a   : > { %v599_v58 = vsub.f32 1.0, %v597_v56 }
 0x22b   : > { %v600_v59 = vsub.f32 1.0, %v598_v57 }
 0x22c   : > { %v603_v60 = vsub.f32 0.0, %v599_v58 }
 0x22d   : > { %v604_v61 = vsub.f32 0.0, %v600_v59 }
 0x22e   : > { %v605_v62 = vsel %vm601_vm4, %v599_v58, %v603_v60 }
 0x22f   : > { %v607_v0 = vadd.f32 1.0, %v605_v62  ;;  %v606_v1 = vsel %vm602_vm5, %v600_v59, %v604_v61 }
 0x230   : > { %v608_v3 = vadd.f32 1.0, %v606_v1 }
 0x231   : > { %v609_v4 = vmul.f32 %v607_v0, %v553_v63 }
 0x232   : > { %v610_v5 = vmul.f32 %v608_v3, %v554_v2 }
 0x233   : > { %611 = vst [vmem:[%s325_s18] sm:$0xff] %v609_v4 }
 0x234   : > { %612 = vst [vmem:[%s325_s18 + $0x8] sm:$0xff] %v610_v5 }
 0x235 PF: > { %s16_s23 = sadd.s32 1, %s805_s23   ;;  %s904_s21 = smov %s801_s22 }
 0x236   : > { %p13_p5 = scmp.ge.s32.totalorder %s16_s23, 4   ;;  %s905_s22 = smov %s907_s24 }
 0x238   :  { %15 = sbr.rel (!%p13_p5) target bundleno = 2 (0x2), region = 77 }

</bundles_post_ra>
